<compile_context>
chip_gen: v7x
topology: tpu7x:2x2x1
jax: 0.10.0
libtpu: 0.0.40
codegen_flags: <defaults>
</compile_context>

<pallas_src>
import functools

import jax
import jax.numpy as jnp
import numpy as np
from jax.experimental import pallas as pl
from jax.experimental.pallas import tpu as pltpu


def _round_up(x: int, m: int) -> int:
    return ((x + m - 1) // m) * m


# ---------------------------------------------------------------------------
# Fused kernel: Phi built once per batch tile (n == 0), then out = Phi @ W tile.
# ---------------------------------------------------------------------------
def _kan_fused_kernel(x_ref, w_ref, o_ref, phi_ref, *,
                      centers, inv_two_sigma2, in_features, in_pad):
    n_basis = len(centers)

    @pl.when(pl.program_id(1) == 0)
    def _():
        x = x_ref[...].astype(jnp.float32)                    # [TM, I_pad]
        if in_pad > in_features:
            col = jax.lax.broadcasted_iota(jnp.int32, x.shape, 1)
            valid = col < in_features
        # Gaussian-RBF basis chunks (lane-aligned segments of width I_pad).
        for a, mu in enumerate(centers):
            d = x - mu
            basis = jnp.exp(-(d * d) * inv_two_sigma2)        # EUP exp
            if in_pad > in_features:
                basis = jnp.where(valid, basis, 0.0)          # kill pad columns
            phi_ref[:, a * in_pad:(a + 1) * in_pad] = basis.astype(phi_ref.dtype)
        # Residual activation chunk (SiLU(0) == 0, so padding is already safe).
        silu = x * jax.nn.sigmoid(x)
        phi_ref[:, n_basis * in_pad:(n_basis + 1) * in_pad] = silu.astype(phi_ref.dtype)

    # Single MXU contraction over the full K for this (m, n) tile.
    o_ref[...] = jnp.dot(phi_ref[...], w_ref[...],
                         preferred_element_type=jnp.float32).astype(o_ref.dtype)


# ---------------------------------------------------------------------------
# One-time parameter preparation (call once per parameter update, NOT per fwd).
# ---------------------------------------------------------------------------
def prepare_linear_kan_weights(c, w_s, w_b, *, mxu_dtype=jnp.bfloat16):
    """Fold w_s into c and pack [c*w_s ; w_b] transposed into W : [K, O_pad]."""
    A, O, I = c.shape
    assert w_s.shape == (O, I) and w_b.shape == (O, I)
    I_pad = _round_up(I, 128)
    O_pad = _round_up(O, 128)
    cw = (c * w_s[None, :, :]).transpose(0, 2, 1)             # [A, I, O]
    wb_t = jnp.transpose(w_b)[None, :, :]                     # [1, I, O]
    w_full = jnp.concatenate([cw, wb_t], axis=0)              # [A+1, I, O]
    w_full = jnp.pad(w_full, ((0, 0), (0, I_pad - I), (0, O_pad - O)))
    w_ko = w_full.reshape((A + 1) * I_pad, O_pad).astype(mxu_dtype)
    return w_ko                                               # [K_total, O_pad]


# ---------------------------------------------------------------------------
# Tile sizing: grow toward (256, 512) but respect a v7x-safe VMEM budget.
# ---------------------------------------------------------------------------
def _choose_tiles(B, I_pad, O_pad, K_total, out_bytes,
                  budget_bytes=40 * 1024 * 1024):
    TM = min(256, _round_up(B, 16))
    TN = 128
    for cand in (256, 512):
        if O_pad % cand == 0:
            TN = cand

    def vmem(tm, tn):
        return (2 * tm * I_pad * 4          # x double-buffer (f32)
                + 2 * K_total * tn * 2      # W double-buffer (bf16)
                + 2 * tm * tn * out_bytes   # out double-buffer
                + tm * K_total * 2)         # Phi scratch (bf16)

    while vmem(TM, TN) > budget_bytes and TN > 128 and (TN // 2) % 128 == 0:
        TN //= 2
    while vmem(TM, TN) > budget_bytes and TM > 16:
        TM = max(16, TM // 2)
    return TM, TN


# ---------------------------------------------------------------------------
# Forward wrapper
# ---------------------------------------------------------------------------
def linear_kan(x, w_ko, *, in_features, out_features, centers, sigma,
               out_dtype=None, mxu_dtype=jnp.bfloat16):
    B, I = x.shape
    assert I == in_features
    A1 = len(centers) + 1
    I_pad = _round_up(I, 128)
    O_pad = _round_up(out_features, 128)
    K_total = A1 * I_pad
    assert w_ko.shape == (K_total, O_pad), (w_ko.shape, (K_total, O_pad))

    out_dtype = out_dtype or x.dtype
    out_bytes = jnp.dtype(out_dtype).itemsize

    TM, TN = _choose_tiles(B, I_pad, O_pad, K_total, out_bytes)
    B_pad = _round_up(B, TM)

    if B_pad != B or I_pad != I:
        x = jnp.pad(x, ((0, B_pad - B), (0, I_pad - I)))

    kernel = functools.partial(
        _kan_fused_kernel,
        centers=tuple(float(m) for m in centers),
        inv_two_sigma2=float(1.0 / (2.0 * sigma * sigma)),
        in_features=in_features, in_pad=I_pad)

    m_tiles = B_pad // TM
    n_tiles = O_pad // TN

    out_pad = pl.pallas_call(
        kernel,
        out_shape=jax.ShapeDtypeStruct((B_pad, O_pad), out_dtype),
        grid=(m_tiles, n_tiles),
        in_specs=[pl.BlockSpec((TM, I_pad), lambda m, n: (m, 0)),
                  pl.BlockSpec((K_total, TN), lambda m, n: (0, n))],
        out_specs=pl.BlockSpec((TM, TN), lambda m, n: (m, n)),
        scratch_shapes=[pltpu.VMEM((TM, K_total), mxu_dtype)],
        compiler_params=pltpu.CompilerParams(
            # N axis carries the Phi-scratch dependence -> must be serial.
            dimension_semantics=("parallel", "arbitrary"),
            vmem_limit_bytes=48 * 1024 * 1024),
        cost_estimate=pl.CostEstimate(
            flops=2 * B_pad * O_pad * K_total + 6 * B_pad * I_pad * A1,
            transcendentals=B_pad * I_pad * A1,
            bytes_accessed=(B_pad * I_pad * 4
                            + K_total * O_pad * 2 * m_tiles
                            + B_pad * O_pad * out_bytes)),
    )(x, w_ko)

    return out_pad[:B, :out_features]


def linear_kan_reference(x, c, w_s, w_b, centers, sigma):
    """Pure-JAX f32 reference mirroring the torch einsum chain."""
    basis = jnp.exp(-(x[:, None, :] - centers[None, :, None]) ** 2
                    / (2.0 * sigma * sigma))                       # [B, A, I]
    spline = jnp.einsum('bai,aoi->boi', basis, c)                  # [B, O, I]
    silu = x * jax.nn.sigmoid(x)
    full = jnp.einsum('boi,oi->boi', spline, w_s) \
         + jnp.einsum('bi,oi->boi', silu, w_b)
    return jnp.sum(full, axis=2)                                   # [B, O]


if __name__ == "__main__":
    # Small shapes consistent with the module's 2-D forward.
    B, I, O, A = 8, 32, 16, 8
    sigma = 2.0 / (A - 1)
    centers = np.linspace(-1.0, 1.0, A)

    key = jax.random.PRNGKey(0)
    kx, kc, kb = jax.random.split(key, 3)

    x = jax.random.normal(kx, (B, I), dtype=jnp.float32)

    # Deterministic parameter init matching __init__:
    #   w_s = ones; w_b ~ xavier_normal_(gain=0.001); c ~ normal_(0, 0.001)
    w_s = jnp.ones((O, I), dtype=jnp.float32)
    xavier_std = 0.001 * np.sqrt(2.0 / (I + O))
    w_b = xavier_std * jax.random.normal(kb, (O, I), dtype=jnp.float32)
    c = 0.001 * jax.random.normal(kc, (A, O, I), dtype=jnp.float32)

    # One-time weight prep (per parameter update), hoisted out of the fwd path.
    w_ko = prepare_linear_kan_weights(c, w_s, w_b)

    out = linear_kan(x, w_ko, in_features=I, out_features=O,
                     centers=centers, sigma=sigma)
    out = jax.block_until_ready(out)

    ref = linear_kan_reference(x, c, w_s, w_b, jnp.asarray(centers), sigma)
    assert out.shape == (B, O)
    max_err = float(jnp.max(jnp.abs(out - ref)))
    # bf16 MXU inputs with f32 accumulation: expected abs error ~1e-5 at these
    # scales (weights ~1e-3); tolerance documents the bf16 weight cast.
    assert jnp.allclose(out, ref, atol=3e-4, rtol=2e-2), f"mismatch: {max_err}"

    print("KERNEL_OK")
</pallas_src>

<mosaic_0001>
module attributes {stable_mosaic.version = 11 : i64} {
  func.func @_kan_fused_kernel(%arg0: i32, %arg1: i32, %arg2: memref<16x128xf32, #tpu.memory_space<vmem>>, %arg3: memref<1152x128xbf16, #tpu.memory_space<vmem>>, %arg4: memref<16x128xf32, #tpu.memory_space<vmem>>, %arg5: memref<16x1152xbf16, #tpu.memory_space<vmem>>) attributes {dimension_semantics = [#tpu.dimension_semantics<parallel>, #tpu.dimension_semantics<arbitrary>], iteration_bounds = array<i64: 1, 1>, scalar_prefetch = 0 : i64, scratch_operands = 1 : i64, tpu.core_type = #tpu.core_type<tc>, window_params = [{transform_indices = @transform_0, window_bounds = array<i64: 16, 128>}, {transform_indices = @transform_1, window_bounds = array<i64: 1152, 128>}, {transform_indices = @transform_2, window_bounds = array<i64: 16, 128>}]} {
    %c0_i32 = arith.constant 0 : i32
    %0 = arith.cmpi eq, %arg1, %c0_i32 : i32
    %1 = arith.extui %0 : i1 to i32
    %c0_i32_0 = arith.constant 0 : i32
    %2 = arith.cmpi ne, %1, %c0_i32_0 : i32
    scf.if %2 {
      %c0_6 = arith.constant 0 : index
      %c0_7 = arith.constant 0 : index
      %7 = vector.load %arg2[%c0_6, %c0_7] : memref<16x128xf32, #tpu.memory_space<vmem>>, vector<16x128xf32>
      %8 = tpu.iota {dimensions = array<i32: 1>} : vector<16x128xi32>
      %c32_i32 = arith.constant 32 : i32
      %9 = vector.broadcast %c32_i32 : i32 to vector<16x128xi32>
      %10 = arith.cmpi slt, %8, %9 : vector<16x128xi32>
      %cst_8 = arith.constant -1.000000e+00 : f32
      %11 = vector.broadcast %cst_8 : f32 to vector<16x128xf32>
      %12 = arith.subf %7, %11 : vector<16x128xf32>
      %13 = arith.mulf %12, %12 : vector<16x128xf32>
      %cst_9 = arith.constant 0.000000e+00 : f32
      %14 = vector.broadcast %cst_9 : f32 to vector<16x128xf32>
      %15 = arith.subf %14, %13 : vector<16x128xf32>
      %cst_10 = arith.constant 6.125000e+00 : f32
      %16 = vector.broadcast %cst_10 : f32 to vector<16x128xf32>
      %17 = arith.mulf %15, %16 : vector<16x128xf32>
      %18 = math.exp %17 : vector<16x128xf32>
      %cst_11 = arith.constant 0.000000e+00 : f32
      %19 = vector.broadcast %cst_11 : f32 to vector<16x128xf32>
      %20 = arith.select %10, %18, %19 : vector<16x128xi1>, vector<16x128xf32>
      %21 = arith.truncf %20 : vector<16x128xf32> to vector<16x128xbf16>
      %c0_12 = arith.constant 0 : index
      %c0_13 = arith.constant 0 : index
      %22 = vector.load %arg5[%c0_12, %c0_13] : memref<16x1152xbf16, #tpu.memory_space<vmem>>, vector<16x128xbf16>
      tpu.vector_store %arg5[%c0_12, %c0_13], %21 {strides = array<i32>} : memref<16x1152xbf16, #tpu.memory_space<vmem>>, vector<16x128xbf16>,
      %cst_14 = arith.constant -0.714285731 : f32
      %23 = vector.broadcast %cst_14 : f32 to vector<16x128xf32>
      %24 = arith.subf %7, %23 : vector<16x128xf32>
      %25 = arith.mulf %24, %24 : vector<16x128xf32>
      %cst_15 = arith.constant 0.000000e+00 : f32
      %26 = vector.broadcast %cst_15 : f32 to vector<16x128xf32>
      %27 = arith.subf %26, %25 : vector<16x128xf32>
      %cst_16 = arith.constant 6.125000e+00 : f32
      %28 = vector.broadcast %cst_16 : f32 to vector<16x128xf32>
      %29 = arith.mulf %27, %28 : vector<16x128xf32>
      %30 = math.exp %29 : vector<16x128xf32>
      %cst_17 = arith.constant 0.000000e+00 : f32
      %31 = vector.broadcast %cst_17 : f32 to vector<16x128xf32>
      %32 = arith.select %10, %30, %31 : vector<16x128xi1>, vector<16x128xf32>
      %33 = arith.truncf %32 : vector<16x128xf32> to vector<16x128xbf16>
      %c0_18 = arith.constant 0 : index
      %c128 = arith.constant 128 : index
      %34 = vector.load %arg5[%c0_18, %c128] : memref<16x1152xbf16, #tpu.memory_space<vmem>>, vector<16x128xbf16>
      tpu.vector_store %arg5[%c0_18, %c128], %33 {strides = array<i32>} : memref<16x1152xbf16, #tpu.memory_space<vmem>>, vector<16x128xbf16>,
      %cst_19 = arith.constant -0.428571433 : f32
      %35 = vector.broadcast %cst_19 : f32 to vector<16x128xf32>
      %36 = arith.subf %7, %35 : vector<16x128xf32>
      %37 = arith.mulf %36, %36 : vector<16x128xf32>
      %cst_20 = arith.constant 0.000000e+00 : f32
      %38 = vector.broadcast %cst_20 : f32 to vector<16x128xf32>
      %39 = arith.subf %38, %37 : vector<16x128xf32>
      %cst_21 = arith.constant 6.125000e+00 : f32
      %40 = vector.broadcast %cst_21 : f32 to vector<16x128xf32>
      %41 = arith.mulf %39, %40 : vector<16x128xf32>
      %42 = math.exp %41 : vector<16x128xf32>
      %cst_22 = arith.constant 0.000000e+00 : f32
      %43 = vector.broadcast %cst_22 : f32 to vector<16x128xf32>
      %44 = arith.select %10, %42, %43 : vector<16x128xi1>, vector<16x128xf32>
      %45 = arith.truncf %44 : vector<16x128xf32> to vector<16x128xbf16>
      %c0_23 = arith.constant 0 : index
      %c256 = arith.constant 256 : index
      %46 = vector.load %arg5[%c0_23, %c256] : memref<16x1152xbf16, #tpu.memory_space<vmem>>, vector<16x128xbf16>
      tpu.vector_store %arg5[%c0_23, %c256], %45 {strides = array<i32>} : memref<16x1152xbf16, #tpu.memory_space<vmem>>, vector<16x128xbf16>,
      %cst_24 = arith.constant -0.142857149 : f32
      %47 = vector.broadcast %cst_24 : f32 to vector<16x128xf32>
      %48 = arith.subf %7, %47 : vector<16x128xf32>
      %49 = arith.mulf %48, %48 : vector<16x128xf32>
      %cst_25 = arith.constant 0.000000e+00 : f32
      %50 = vector.broadcast %cst_25 : f32 to vector<16x128xf32>
      %51 = arith.subf %50, %49 : vector<16x128xf32>
      %cst_26 = arith.constant 6.125000e+00 : f32
      %52 = vector.broadcast %cst_26 : f32 to vector<16x128xf32>
      %53 = arith.mulf %51, %52 : vector<16x128xf32>
      %54 = math.exp %53 : vector<16x128xf32>
      %cst_27 = arith.constant 0.000000e+00 : f32
      %55 = vector.broadcast %cst_27 : f32 to vector<16x128xf32>
      %56 = arith.select %10, %54, %55 : vector<16x128xi1>, vector<16x128xf32>
      %57 = arith.truncf %56 : vector<16x128xf32> to vector<16x128xbf16>
      %c0_28 = arith.constant 0 : index
      %c384 = arith.constant 384 : index
      %58 = vector.load %arg5[%c0_28, %c384] : memref<16x1152xbf16, #tpu.memory_space<vmem>>, vector<16x128xbf16>
      tpu.vector_store %arg5[%c0_28, %c384], %57 {strides = array<i32>} : memref<16x1152xbf16, #tpu.memory_space<vmem>>, vector<16x128xbf16>,
      %cst_29 = arith.constant 0.142857149 : f32
      %59 = vector.broadcast %cst_29 : f32 to vector<16x128xf32>
      %60 = arith.subf %7, %59 : vector<16x128xf32>
      %61 = arith.mulf %60, %60 : vector<16x128xf32>
      %cst_30 = arith.constant 0.000000e+00 : f32
      %62 = vector.broadcast %cst_30 : f32 to vector<16x128xf32>
      %63 = arith.subf %62, %61 : vector<16x128xf32>
      %cst_31 = arith.constant 6.125000e+00 : f32
      %64 = vector.broadcast %cst_31 : f32 to vector<16x128xf32>
      %65 = arith.mulf %63, %64 : vector<16x128xf32>
      %66 = math.exp %65 : vector<16x128xf32>
      %cst_32 = arith.constant 0.000000e+00 : f32
      %67 = vector.broadcast %cst_32 : f32 to vector<16x128xf32>
      %68 = arith.select %10, %66, %67 : vector<16x128xi1>, vector<16x128xf32>
      %69 = arith.truncf %68 : vector<16x128xf32> to vector<16x128xbf16>
      %c0_33 = arith.constant 0 : index
      %c512 = arith.constant 512 : index
      %70 = vector.load %arg5[%c0_33, %c512] : memref<16x1152xbf16, #tpu.memory_space<vmem>>, vector<16x128xbf16>
      tpu.vector_store %arg5[%c0_33, %c512], %69 {strides = array<i32>} : memref<16x1152xbf16, #tpu.memory_space<vmem>>, vector<16x128xbf16>,
      %cst_34 = arith.constant 0.428571433 : f32
      %71 = vector.broadcast %cst_34 : f32 to vector<16x128xf32>
      %72 = arith.subf %7, %71 : vector<16x128xf32>
      %73 = arith.mulf %72, %72 : vector<16x128xf32>
      %cst_35 = arith.constant 0.000000e+00 : f32
      %74 = vector.broadcast %cst_35 : f32 to vector<16x128xf32>
      %75 = arith.subf %74, %73 : vector<16x128xf32>
      %cst_36 = arith.constant 6.125000e+00 : f32
      %76 = vector.broadcast %cst_36 : f32 to vector<16x128xf32>
      %77 = arith.mulf %75, %76 : vector<16x128xf32>
      %78 = math.exp %77 : vector<16x128xf32>
      %cst_37 = arith.constant 0.000000e+00 : f32
      %79 = vector.broadcast %cst_37 : f32 to vector<16x128xf32>
      %80 = arith.select %10, %78, %79 : vector<16x128xi1>, vector<16x128xf32>
      %81 = arith.truncf %80 : vector<16x128xf32> to vector<16x128xbf16>
      %c0_38 = arith.constant 0 : index
      %c640 = arith.constant 640 : index
      %82 = vector.load %arg5[%c0_38, %c640] : memref<16x1152xbf16, #tpu.memory_space<vmem>>, vector<16x128xbf16>
      tpu.vector_store %arg5[%c0_38, %c640], %81 {strides = array<i32>} : memref<16x1152xbf16, #tpu.memory_space<vmem>>, vector<16x128xbf16>,
      %cst_39 = arith.constant 0.714285731 : f32
      %83 = vector.broadcast %cst_39 : f32 to vector<16x128xf32>
      %84 = arith.subf %7, %83 : vector<16x128xf32>
      %85 = arith.mulf %84, %84 : vector<16x128xf32>
      %cst_40 = arith.constant 0.000000e+00 : f32
      %86 = vector.broadcast %cst_40 : f32 to vector<16x128xf32>
      %87 = arith.subf %86, %85 : vector<16x128xf32>
      %cst_41 = arith.constant 6.125000e+00 : f32
      %88 = vector.broadcast %cst_41 : f32 to vector<16x128xf32>
      %89 = arith.mulf %87, %88 : vector<16x128xf32>
      %90 = math.exp %89 : vector<16x128xf32>
      %cst_42 = arith.constant 0.000000e+00 : f32
      %91 = vector.broadcast %cst_42 : f32 to vector<16x128xf32>
      %92 = arith.select %10, %90, %91 : vector<16x128xi1>, vector<16x128xf32>
      %93 = arith.truncf %92 : vector<16x128xf32> to vector<16x128xbf16>
      %c0_43 = arith.constant 0 : index
      %c768 = arith.constant 768 : index
      %94 = vector.load %arg5[%c0_43, %c768] : memref<16x1152xbf16, #tpu.memory_space<vmem>>, vector<16x128xbf16>
      tpu.vector_store %arg5[%c0_43, %c768], %93 {strides = array<i32>} : memref<16x1152xbf16, #tpu.memory_space<vmem>>, vector<16x128xbf16>,
      %cst_44 = arith.constant 1.000000e+00 : f32
      %95 = vector.broadcast %cst_44 : f32 to vector<16x128xf32>
      %96 = arith.subf %7, %95 : vector<16x128xf32>
      %97 = arith.mulf %96, %96 : vector<16x128xf32>
      %cst_45 = arith.constant 0.000000e+00 : f32
      %98 = vector.broadcast %cst_45 : f32 to vector<16x128xf32>
      %99 = arith.subf %98, %97 : vector<16x128xf32>
      %cst_46 = arith.constant 6.125000e+00 : f32
      %100 = vector.broadcast %cst_46 : f32 to vector<16x128xf32>
      %101 = arith.mulf %99, %100 : vector<16x128xf32>
      %102 = math.exp %101 : vector<16x128xf32>
      %cst_47 = arith.constant 0.000000e+00 : f32
      %103 = vector.broadcast %cst_47 : f32 to vector<16x128xf32>
      %104 = arith.select %10, %102, %103 : vector<16x128xi1>, vector<16x128xf32>
      %105 = arith.truncf %104 : vector<16x128xf32> to vector<16x128xbf16>
      %c0_48 = arith.constant 0 : index
      %c896 = arith.constant 896 : index
      %106 = vector.load %arg5[%c0_48, %c896] : memref<16x1152xbf16, #tpu.memory_space<vmem>>, vector<16x128xbf16>
      tpu.vector_store %arg5[%c0_48, %c896], %105 {strides = array<i32>} : memref<16x1152xbf16, #tpu.memory_space<vmem>>, vector<16x128xbf16>,
      %107 = arith.negf %7 : vector<16x128xf32>
      %108 = math.exp %107 : vector<16x128xf32>
      %cst_49 = arith.constant 1.000000e+00 : f32
      %109 = vector.broadcast %cst_49 : f32 to vector<16x128xf32>
      %110 = arith.addf %109, %108 : vector<16x128xf32>
      %111 = arith.divf %109, %110 : vector<16x128xf32>
      %112 = arith.mulf %7, %111 : vector<16x128xf32>
      %113 = arith.truncf %112 : vector<16x128xf32> to vector<16x128xbf16>
      %c0_50 = arith.constant 0 : index
      %c1024 = arith.constant 1024 : index
      %114 = vector.load %arg5[%c0_50, %c1024] : memref<16x1152xbf16, #tpu.memory_space<vmem>>, vector<16x128xbf16>
      tpu.vector_store %arg5[%c0_50, %c1024], %113 {strides = array<i32>} : memref<16x1152xbf16, #tpu.memory_space<vmem>>, vector<16x128xbf16>,
    } else {
    }
    %c0 = arith.constant 0 : index
    %c0_1 = arith.constant 0 : index
    %3 = vector.load %arg5[%c0, %c0_1] : memref<16x1152xbf16, #tpu.memory_space<vmem>>, vector<16x1152xbf16>
    %c0_2 = arith.constant 0 : index
    %c0_3 = arith.constant 0 : index
    %4 = vector.load %arg3[%c0_2, %c0_3] : memref<1152x128xbf16, #tpu.memory_space<vmem>>, vector<1152x128xbf16>
    %cst = arith.constant dense<0.000000e+00> : vector<16x128xf32>
    %5 = tpu.matmul %3, %4, %cst {dimension_numbers = #tpu.dot_dimension_numbers<[1], [0], [0], [1], [0, 0, 1, 1], [], []>} : vector<16x1152xbf16>, vector<1152x128xbf16>, vector<16x128xf32> -> vector<16x128xf32>
    %c0_4 = arith.constant 0 : index
    %c0_5 = arith.constant 0 : index
    %6 = vector.load %arg4[%c0_4, %c0_5] : memref<16x128xf32, #tpu.memory_space<vmem>>, vector<16x128xf32>
    tpu.vector_store %arg4[%c0_4, %c0_5], %5 {strides = array<i32>} : memref<16x128xf32, #tpu.memory_space<vmem>>, vector<16x128xf32>,
    return
  }
  func.func @transform_0(%arg0: i32, %arg1: i32) -> (i32, i32) {
    %c0_i32 = arith.constant 0 : i32
    %c0_i32_0 = arith.constant 0 : i32
    return %arg0, %c0_i32 : i32, i32
  }
  func.func @transform_1(%arg0: i32, %arg1: i32) -> (i32, i32) {
    %c0_i32 = arith.constant 0 : i32
    %c0_i32_0 = arith.constant 0 : i32
    return %c0_i32, %arg1 : i32, i32
  }
  func.func @transform_2(%arg0: i32, %arg1: i32) -> (i32, i32) {
    %c0_i32 = arith.constant 0 : i32
    return %arg0, %arg1 : i32, i32
  }
}

</mosaic_0001>

<bundles_post_ra>
// kernel: tpu_custom_call.1
= control target key start
LH: loop header
LB: loop body
LE: loop exit
PB: predicated region body
PF: predicated region fallthrough
CT: control target
= control target key end

     0   :  { %7 = vsyncpa [#allocation4], 0  ;;  %s1538_s0 = inlined_call_operand.hbm [shape: f32[16,128], index: 0, kind: input, shape index: {}]   ;;  %s1539_s1 = inlined_call_operand.hbm [shape: bf16[1152,128], index: 1, kind: input, shape index: {}]   ;;  %s1540_s2 = inlined_call_operand.hbm [shape: f32[16,128], index: 2, kind: output, shape index: {}]  }
   0x1   :  { %8 = vsyncpa [#allocation7], 0 }
   0x2   :  { %9 = vsyncpa [#allocation5], 0  ;;  %s1428_s9 = smov [#allocation3]   ;;  %s1356_s13 = scalar_lea.hbm %s1538_s0, 256 }
   0x3   :  { %s15_s10 = sshll.u32 %s1428_s9, 4  ;;  %p1357_p0 = scmp.ne.s32.totalorder %s1538_s0, %s1356_s13  ;;  %s16_s10 = int_to_ptr.vmem [resolvable:$true] %s15_s10 }
   0x4   :  { %p1360_p1 = scmp.lt.u32.totalorder %s1356_s13, %s1538_s0 }
   0x6   :  { %p1362_p2 = pnand %p1360_p1, %p1357_p0 }
   0x8   :  { %1365 = shalt.err (!%p1362_p2)
}
   0x9   :  { %s1366_s18 = scalar_lea.vmem %s16_s10, 256  ;;  %p1371_p4 = scmp.lt.s32.totalorder %s16_s10, %s16_s10 }
   0xa   :  { %p1367_p3 = scmp.ne.s32.totalorder %s16_s10, %s1366_s18  ;;  %p1372_p5 = scmp.lt.s32.totalorder %s1366_s18, %s1366_s18 }
   0xc   :  { %p1373_p6 = por %p1372_p5, %p1371_p4 }
   0xe   :  { %p1374_p7 = pnand %p1373_p6, %p1367_p3 }
  0x10   :  { %1377 = shalt.err (!%p1374_p7)
}
  0x11   :  { %s1429_s19 = smov 128   ;;  %s1430_s20 = smov 8  }
  0x12   :  { %21 = dma.hbm_to_vmem [thread:$0]  %s1538_s0, 256, %s16_s10, [#allocation4], %s1429_s19, %s1429_s19, %s1430_s20  }
  0x13   :  { %s1431_s23 = smov [#allocation6]   ;;  %s1378_s27 = scalar_lea.hbm %s1539_s1, 9216 }
  0x14   :  { %s27_s24 = sshll.u32 %s1431_s23, 4  ;;  %p1379_p8 = scmp.ne.s32.totalorder %s1539_s1, %s1378_s27  ;;  %s28_s24 = int_to_ptr.vmem [resolvable:$true] %s27_s24 }
  0x15   :  { %p1382_p9 = scmp.lt.u32.totalorder %s1378_s27, %s1539_s1 }
  0x17   :  { %p1384_p10 = pnand %p1382_p9, %p1379_p8 }
  0x19   :  { %1387 = shalt.err (!%p1384_p10)
}
  0x1a   :  { %s1388_s4 = scalar_lea.vmem %s28_s24, 9216  ;;  %p1393_p12 = scmp.lt.s32.totalorder %s28_s24, %s28_s24 }
  0x1b   :  { %p1389_p11 = scmp.ne.s32.totalorder %s28_s24, %s1388_s4  ;;  %p1394_p13 = scmp.lt.s32.totalorder %s1388_s4, %s1388_s4 }
  0x1d   :  { %p1395_p0 = por %p1394_p13, %p1393_p12 }
  0x1f   :  { %p1396_p1 = pnand %p1395_p0, %p1389_p11 }
  0x21   :  { %1399 = shalt.err (!%p1396_p1)
}
  0x22   :  { %s1432_s0 = smov 64   ;;  %s1433_s5 = smov 4  }
  0x23   :  { %33 = dma.hbm_to_vmem [thread:$0]  %s1539_s1, 9216, %s28_s24, [#allocation7], %s1432_s0, %s1432_s0, %s1433_s5  }
  0x24   :  { %1422 = dma.done.wait [#allocation4], 256  }
  0x25   :  { %1423 = vsyncadd [#allocation4], 4294967040 }
  0x26   :  { %1424 = dma.done.wait [#allocation7], 9216  }
  0x27   :  { %1425 = vsyncadd [#allocation7], 4294958080  ;;  %v1244_v0 = vld [vmem:[#allocation6 + $0x40] sm:$0xff]   ;;  %v1248_v4 = vld [vmem:[#allocation6 + $0x48] sm:$0xff]   ;;  %vm1435_vm2 = vmmov 0   ;;  %s1436_s1 = smov [#allocation8]  }
  0x28   :  { %v1245_v1 = vld [vmem:[#allocation6 + $0xc0] sm:$0xff]   ;;  %1118 = vmatprep.subr.bf16.mxu0 %v1244_v0  ;;  %v1249_v5 = vld [vmem:[#allocation6 + $0xc8] sm:$0xff]   ;;  %v1252_v8 = vld [vmem:[#allocation6 + $0x50] sm:$0xff]   ;;  %s991_s8 = sshll.u32 %s1436_s1, 4  ;;  %s992_s8 = int_to_ptr.vmem [resolvable:$true] %s991_s8 }
  0x29   :  { %v1246_v2 = vld [vmem:[#allocation6] sm:$0xff]   ;;  %1140 = vmatprep.subr.bf16.mxu1 %v1245_v1  ;;  %v1250_v6 = vld [vmem:[#allocation6 + $0x8] sm:$0xff]   ;;  %v1253_v9 = vld [vmem:[#allocation6 + $0xd0] sm:$0xff]   ;;  %s1400_s9 = scalar_lea.vmem %s992_s8, 256  ;;  %p1405_p3 = scmp.lt.s32.totalorder %s992_s8, %s992_s8 }
  0x2a   :  { %v1247_v3 = vld [vmem:[#allocation6 + $0x80] sm:$0xff]   ;;  %1119 = vmatpush3.bf16.msra.mxu0 %v1246_v2  ;;  %v1251_v7 = vld [vmem:[#allocation6 + $0x88] sm:$0xff]   ;;  %v1254_v10 = vld [vmem:[#allocation6 + $0x10] sm:$0xff]   ;;  %p1401_p2 = scmp.ne.s32.totalorder %s992_s8, %s1400_s9  ;;  %p1406_p4 = scmp.lt.s32.totalorder %s1400_s9, %s1400_s9 }
  0x2b   :  { %1141 = vmatpush3.bf16.msra.mxu1 %v1247_v3  ;;  %1120 = vmatprep.subr.bf16.mxu0 %v1248_v4  ;;  %v1255_v11 = vld [vmem:[#allocation6 + $0x90] sm:$0xff]   ;;  %v1256_v12 = vld [vmem:[#allocation6 + $0x58] sm:$0xff]   ;;  %v1260_v16 = vld [vmem:[#allocation6 + $0x60] sm:$0xff]  }
  0x2c   :  { %1142 = vmatprep.subr.bf16.mxu1 %v1249_v5  ;;  %v1257_v13 = vld [vmem:[#allocation6 + $0xd8] sm:$0xff]   ;;  %v1261_v17 = vld [vmem:[#allocation6 + $0xe0] sm:$0xff]   ;;  %v1264_v20 = vld [vmem:[#allocation6 + $0x68] sm:$0xff]   ;;  %p1407_p5 = por %p1406_p4, %p1405_p3 }
  0x2d   :  { %v1258_v14 = vld [vmem:[#allocation6 + $0x18] sm:$0xff]   ;;  %v1262_v18 = vld [vmem:[#allocation6 + $0x20] sm:$0xff]   ;;  %v1265_v21 = vld [vmem:[#allocation6 + $0xe8] sm:$0xff]  }
  0x2e   :  { %1121 = vmatpush3.bf16.msra.mxu0 %v1250_v6  ;;  %v1259_v15 = vld [vmem:[#allocation6 + $0x98] sm:$0xff]   ;;  %v1263_v19 = vld [vmem:[#allocation6 + $0xa0] sm:$0xff]   ;;  %v1266_v22 = vld [vmem:[#allocation6 + $0x28] sm:$0xff]   ;;  %p1408_p6 = pnand %p1407_p5, %p1401_p2 }
  0x2f   :  { %1143 = vmatpush3.bf16.msra.mxu1 %v1251_v7  ;;  %1122 = vmatprep.subr.bf16.mxu0 %v1252_v8  ;;  %v1267_v23 = vld [vmem:[#allocation6 + $0xa8] sm:$0xff]   ;;  %v1268_v24 = vld [vmem:[#allocation6 + $0x70] sm:$0xff]   ;;  %v1272_v28 = vld [vmem:[#allocation6 + $0x78] sm:$0xff]   ;;  %v47_v8 = vlaneseq }
  0x30   :  { %1144 = vmatprep.subr.bf16.mxu1 %v1253_v9  ;;  %v1269_v25 = vld [vmem:[#allocation6 + $0xf0] sm:$0xff]   ;;  %v1273_v29 = vld [vmem:[#allocation6 + $0xf8] sm:$0xff]   ;;  %v1276_v45 = vld [vmem:[#allocation6 + $0x140] sm:$0xff]  }
  0x31   :  { %v1270_v26 = vld [vmem:[#allocation6 + $0x30] sm:$0xff]   ;;  %v1274_v30 = vld [vmem:[#allocation6 + $0x38] sm:$0xff]   ;;  %v1278_v54 = vld [vmem:[#allocation6 + $0x1c0] sm:$0xff]  }
  0x32   :  { %1123 = vmatpush3.bf16.msra.mxu0 %v1254_v10  ;;  %v1271_v27 = vld [vmem:[#allocation6 + $0xb0] sm:$0xff]   ;;  %v1275_v31 = vld [vmem:[#allocation6 + $0xb8] sm:$0xff]  }
  0x33   :  { %1145 = vmatpush3.bf16.msra.mxu1 %v1255_v11  ;;  %1124 = vmatprep.subr.bf16.mxu0 %v1256_v12  ;;  %v1479_v32 = vld [vmem:[#allocation3] sm:$0xff]  ;;  %v1481_v33 = vld [vmem:[#allocation3 + $0x8] sm:$0xff] }
  0x34   :  { %1146 = vmatprep.subr.bf16.mxu1 %v1257_v13  ;;  %v1006_v34 = vadd.f32 0.71428573, %v1479_v32  ;;  %v1007_v35 = vadd.f32 0.71428573, %v1481_v33  ;;  %v1010_v36 = vadd.f32 0.14285715, %v1479_v32 }
  0x35   :  { %v1011_v37 = vadd.f32 0.14285715, %v1481_v33  ;;  %v1004_v38 = vadd.f32 1.0, %v1479_v32  ;;  %v1005_v39 = vadd.f32 1.0, %v1481_v33  ;;  %v1008_v40 = vadd.f32 0.42857143, %v1479_v32 }
  0x36   :  { %1125 = vmatpush3.bf16.msra.mxu0 %v1258_v14  ;;  %v68_v41 = vmul.f32 %v1006_v34, %v1006_v34  ;;  %v69_v42 = vmul.f32 %v1007_v35, %v1007_v35  ;;  %v100_v43 = vmul.f32 %v1010_v36, %v1010_v36  ;;  %v1009_v44 = vadd.f32 0.42857143, %v1481_v33  ;;  %v1282_v36 = vld [vmem:[#allocation6 + $0x1c8] sm:$0xff]  }
  0x37   :  { %1147 = vmatpush3.bf16.msra.mxu1 %v1259_v15  ;;  %1126 = vmatprep.subr.bf16.mxu0 %v1260_v16  ;;  %v101_v46 = vmul.f32 %v1011_v37, %v1011_v37  ;;  %v52_v47 = vmul.f32 %v1004_v38, %v1004_v38  ;;  %v53_v48 = vmul.f32 %v1005_v39, %v1005_v39  ;;  %v48_v13 = vand.u32 127, %v47_v8  ;;  %v1283_v38 = vld [vmem:[#allocation6 + $0x188] sm:$0xff]   ;;  %v1284_v39 = vld [vmem:[#allocation6 + $0x150] sm:$0xff]  }
  0x38   :  { %1148 = vmatprep.subr.bf16.mxu1 %v1261_v17  ;;  %v84_v49 = vmul.f32 %v1008_v40, %v1008_v40  ;;  %v70_v50 = vsub.f32 0.0, %v68_v41  ;;  %v71_v51 = vsub.f32 0.0, %v69_v42  ;;  %v102_v52 = vsub.f32 0.0, %v100_v43  ;;  %v1285_v40 = vld [vmem:[#allocation6 + $0x110] sm:$0xff]  }
  0x39   :  { %v85_v53 = vmul.f32 %v1009_v44, %v1009_v44  ;;  %v103_v55 = vsub.f32 0.0, %v101_v46  ;;  %v54_v56 = vsub.f32 0.0, %v52_v47  ;;  %v55_v57 = vsub.f32 0.0, %v53_v48  ;;  %v1286_v42 = vld [vmem:[#allocation6 + $0x1d0] sm:$0xff]   ;;  %v1289_v46 = vld [vmem:[#allocation6 + $0x118] sm:$0xff]  }
  0x3a   :  { %1127 = vmatpush3.bf16.msra.mxu0 %v1262_v18  ;;  %v86_v58 = vsub.f32 0.0, %v84_v49  ;;  %v72_v59 = vmul.f32 6.125, %v70_v50  ;;  %v73_v60 = vmul.f32 6.125, %v71_v51  ;;  %v104_v61 = vmul.f32 6.125, %v102_v52  ;;  %v1287_v44 = vld [vmem:[#allocation6 + $0x190] sm:$0xff]   ;;  %v1290_v48 = vld [vmem:[#allocation6 + $0x1d8] sm:$0xff]  }
  0x3b   :  { %1149 = vmatpush3.bf16.msra.mxu1 %v1263_v19  ;;  %1128 = vmatprep.subr.bf16.mxu0 %v1264_v20  ;;  %v87_v62 = vsub.f32 0.0, %v85_v53  ;;  %v105_v63 = vmul.f32 6.125, %v103_v55  ;;  %v56_v0 = vmul.f32 6.125, %v54_v56  ;;  %v57_v1 = vmul.f32 6.125, %v55_v57  ;;  %v1291_v50 = vld [vmem:[#allocation6 + $0x198] sm:$0xff]   ;;  %v1292_v51 = vld [vmem:[#allocation6 + $0x160] sm:$0xff]  }
  0x3c   :  { %1150 = vmatprep.subr.bf16.mxu1 %v1265_v21  ;;  %v88_v2 = vmul.f32 6.125, %v86_v58  ;;  %v74_v3 = vmul.f32 1.442695, %v72_v59  ;;  %v76_v4 = vmul.f32 1.442695, %v73_v60  ;;  %vm49_vm0 = vcmp.lt.s32.totalorder %v48_v13, 32 }
  0x3d   :  { %v106_v5 = vmul.f32 1.442695, %v104_v61  ;;  %v108_v6 = vmul.f32 1.442695, %v105_v63  ;;  %v58_v7 = vmul.f32 1.442695, %v56_v0  ;;  %vm1491_vm1 = vmpackc.low %vm49_vm0, %vm49_vm0 }
  0x3e   :  { %1129 = vmatpush3.bf16.msra.mxu0 %v1266_v22  ;;  %1316 = vpow2.f32 %v74_v3  ;;  %v60_v9 = vmul.f32 1.442695, %v57_v1  ;;  %v89_v10 = vmul.f32 6.125, %v87_v62  ;;  %v90_v11 = vmul.f32 1.442695, %v88_v2  ;;  %v1293_v59 = vld [vmem:[#allocation6 + $0x120] sm:$0xff]  }
  0x3f   :  { %1151 = vmatpush3.bf16.msra.mxu1 %v1267_v23  ;;  %1130 = vmatprep.subr.bf16.mxu0 %v1268_v24  ;;  %1318 = vpow2.f32 %v76_v4  ;;  %v1018_v20 = vadd.f32 -1.0, %v1479_v32  ;;  %v1277_v23 = vld [vmem:[#allocation6 + $0x100] sm:$0xff]   ;;  %v1019_v24 = vadd.f32 -1.0, %v1481_v33  ;;  %v1014_v52 = vadd.f32 -0.42857143, %v1479_v32  ;;  %v1296_v3 = vld [vmem:[#allocation6 + $0x168] sm:$0xff]  }
  0x40   :  { %1152 = vmatprep.subr.bf16.mxu1 %v1269_v25  ;;  %1320 = vpow2.f32 %v106_v5  ;;  %v92_v12 = vmul.f32 1.442695, %v89_v10  ;;  %v1015_v53 = vadd.f32 -0.42857143, %v1481_v33  ;;  %v1013_v57 = vadd.f32 -0.14285715, %v1481_v33 }
  0x41   :  { %1322 = vpow2.f32 %v108_v6  ;;  %v164_v34 = vmul.f32 %v1018_v20, %v1018_v20  ;;  %v165_v37 = vmul.f32 %v1019_v24, %v1019_v24  ;;  %v132_v55 = vmul.f32 %v1014_v52, %v1014_v52  ;;  %v1294_v60 = vld [vmem:[#allocation6 + $0x1e0] sm:$0xff]  }
  0x42   :  { %1131 = vmatpush3.bf16.msra.mxu0 %v1270_v26  ;;  %1324 = vpow2.f32 %v58_v7  ;;  %v1279_v26 = vld [vmem:[#allocation6 + $0x180] sm:$0xff]   ;;  %v133_v56 = vmul.f32 %v1015_v53, %v1015_v53  ;;  %v117_v2 = vmul.f32 %v1013_v57, %v1013_v57  ;;  %v1016_v5 = vadd.f32 -0.71428573, %v1479_v32  ;;  %v1297_v7 = vld [vmem:[#allocation6 + $0x128] sm:$0xff]   ;;  %v1310_v57 = vld [vmem:[#allocation6 + $0x210] sm:$0xff]  }
  0x43   :  { %1153 = vmatpush3.bf16.msra.mxu1 %v1271_v27  ;;  %1132 = vmatprep.subr.bf16.mxu0 %v1272_v28  ;;  %1326 = vpow2.f32 %v60_v9  ;;  %v166_v41 = vsub.f32 0.0, %v164_v34  ;;  %v167_v43 = vsub.f32 0.0, %v165_v37  ;;  %v1295_v63 = vld [vmem:[#allocation6 + $0x1a0] sm:$0xff]   ;;  %v134_v0 = vsub.f32 0.0, %v132_v55  ;;  %v1306_v37 = vld [vmem:[#allocation6 + $0x1f8] sm:$0xff]  }
  0x44   :  { %1154 = vmatprep.subr.bf16.mxu1 %v1273_v29  ;;  %1328 = vpow2.f32 %v90_v11  ;;  %v1280_v29 = vld [vmem:[#allocation6 + $0x148] sm:$0xff]   ;;  %v135_v1 = vsub.f32 0.0, %v133_v56  ;;  %v1017_v6 = vadd.f32 -0.71428573, %v1481_v33  ;;  %v119_v10 = vsub.f32 0.0, %v117_v2 }
  0x45   :  { %1330 = vpow2.f32 %v92_v12  ;;  %v168_v47 = vmul.f32 6.125, %v166_v41  ;;  %v169_v49 = vmul.f32 6.125, %v167_v43  ;;  %v136_v8 = vmul.f32 6.125, %v134_v0  ;;  %v1298_v11 = vld [vmem:[#allocation6 + $0x1e8] sm:$0xff]   ;;  %v1314_v0 = vld [vmem:[#allocation6 + $0x230] sm:$0xff]  }
  0x46   :  { %1133 = vmatpush3.bf16.msra.mxu0 %v1274_v30  ;;  %v137_v9 = vmul.f32 6.125, %v135_v1  ;;  %v148_v13 = vmul.f32 %v1016_v5, %v1016_v5  ;;  %v121_v20 = vmul.f32 6.125, %v119_v10  ;;  %v1021_v41 = vmul.f32 -1.442695, %v1481_v33 }
  0x47   :  { %1155 = vmatpush3.bf16.msra.mxu1 %v1275_v31  ;;  %1162 = vmatprep.subr.bf16.mxu0 %v1276_v45  ;;  %v1281_v31 = vld [vmem:[#allocation6 + $0x108] sm:$0xff]   ;;  %v1288_v45 = vld [vmem:[#allocation6 + $0x158] sm:$0xff]   ;;  %v170_v58 = vmul.f32 1.442695, %v168_v47  ;;  %v172_v62 = vmul.f32 1.442695, %v169_v49 }
  0x48   :  { %1184 = vmatprep.subr.bf16.mxu1 %v1278_v54  ;;  %v1317_v14 = vpop.eup %1316  ;;  %v1012_v54 = vadd.f32 -0.14285715, %v1479_v32  ;;  %v1308_v49 = vld [vmem:[#allocation6 + $0x200] sm:$0xff]  }
  0x49   :  { %v1319_v15 = vpop.eup %1318  ;;  %1332 = vpow2.f32 %v170_v58 }
  0x4a   :  { %v1321_v17 = vpop.eup %1320  ;;  %v1095_v18 = vpack.c.bf16 %v1319_v15, %v1317_v14  ;;  %v116_v61 = vmul.f32 %v1012_v54, %v1012_v54  ;;  %1334 = vpow2.f32 %v172_v62  ;;  %v149_v14 = vmul.f32 %v1017_v6, %v1017_v6  ;;  %v1299_v15 = vld [vmem:[#allocation6 + $0x1a8] sm:$0xff]  }
  0x4b   :  { %v1323_v19 = vpop.eup %1322  ;;  %v1309_v54 = vld [vmem:[#allocation6 + $0x208] sm:$0xff]  }
  0x4c   :  { %v1325_v21 = vpop.eup %1324  ;;  %1096 = vmatprep.mubr.msk.bf16.mxu0 %vm1491_vm1, %v1095_v18  ;;  %v1101_v22 = vpack.c.bf16 %v1323_v19, %v1321_v17  ;;  %v118_v4 = vsub.f32 0.0, %v116_v61  ;;  %v1300_v17 = vld [vmem:[#allocation6 + $0x170] sm:$0xff]   ;;  %v138_v18 = vmul.f32 1.442695, %v136_v8  ;;  %v140_v19 = vmul.f32 1.442695, %v137_v9 }
  0x4d   :  { %v1327_v25 = vpop.eup %1326  ;;  %v151_v24 = vsub.f32 0.0, %v149_v14  ;;  %v1312_v61 = vld [vmem:[#allocation6 + $0x220] sm:$0xff]   ;;  %v1313_v62 = vld [vmem:[#allocation6 + $0x228] sm:$0xff]  }
  0x4e   :  { %v1329_v27 = vpop.eup %1328  ;;  %1102 = vmatprep.mubr.msk.bf16.mxu1 %vm1491_vm1, %v1101_v22  ;;  %v1098_v28 = vpack.c.bf16 %v1327_v25, %v1325_v21  ;;  %v120_v12 = vmul.f32 6.125, %v118_v4  ;;  %v1302_v21 = vld [vmem:[#allocation6 + $0x1f0] sm:$0xff]   ;;  %1336 = vpow2.f32 %v138_v18 }
  0x4f   :  { %v1331_v30 = vpop.eup %1330  ;;  %v1301_v25 = vld [vmem:[#allocation6 + $0x130] sm:$0xff]   ;;  %1338 = vpow2.f32 %v140_v19 }
  0x50   :  { %1099 = vmatmul.mubr.msk.bf16.vlgmr.msra.gmra.mrb[0].mxu0 %vm1491_vm1, %v1098_v28  ;;  %v1104_v35 = vpack.c.bf16 %v1331_v30, %v1329_v27  ;;  %v122_v22 = vmul.f32 1.442695, %v120_v12  ;;  %v153_v28 = vmul.f32 6.125, %v151_v24 }
  0x51   :  { %1163 = vmatpush3.bf16.msra.mxu0 %v1277_v23  ;;  %v150_v23 = vsub.f32 0.0, %v148_v13 }
  0x52   :  { %1105 = vmatmul.mubr.msk.bf16.vlgmr.msra.gmra.mrb[0].mxu1 %vm1491_vm1, %v1104_v35  ;;  %1164 = vmatprep.subr.bf16.mxu0 %v1280_v29  ;;  %v1304_v29 = vld [vmem:[#allocation6 + $0x178] sm:$0xff]   ;;  %1340 = vpow2.f32 %v122_v22  ;;  %v1303_v35 = vld [vmem:[#allocation6 + $0x1b0] sm:$0xff]  }
  0x53   :  { %1185 = vmatpush3.bf16.msra.mxu1 %v1279_v26  ;;  %v124_v26 = vmul.f32 1.442695, %v121_v20  ;;  %v152_v27 = vmul.f32 6.125, %v150_v23  ;;  %v1333_v34 = vpop.eup %1332 }
  0x54   :  { %1186 = vmatprep.subr.bf16.mxu1 %v1282_v36  ;;  %v1335_v36 = vpop.eup %1334 }
  0x55   :  { %1165 = vmatpush3.bf16.msra.mxu0 %v1281_v31  ;;  %1342 = vpow2.f32 %v124_v26  ;;  %v154_v30 = vmul.f32 1.442695, %v152_v27  ;;  %v156_v31 = vmul.f32 1.442695, %v153_v28 }
  0x56   :  { %1166 = vmatprep.subr.bf16.mxu0 %v1284_v39  ;;  %v1305_v39 = vld [vmem:[#allocation6 + $0x138] sm:$0xff]  }
  0x57   :  { %1187 = vmatpush3.bf16.msra.mxu1 %v1283_v38  ;;  %1344 = vpow2.f32 %v154_v30  ;;  %v1020_v38 = vmul.f32 -1.442695, %v1479_v32 }
  0x58   :  { %1188 = vmatprep.subr.bf16.mxu1 %v1286_v42  ;;  %1346 = vpow2.f32 %v156_v31  ;;  %v1307_v42 = vld [vmem:[#allocation6 + $0x1b8] sm:$0xff]   ;;  %v1337_v43 = vpop.eup %1336 }
  0x59   :  { %1167 = vmatpush3.bf16.msra.mxu0 %v1285_v40  ;;  %v1113_v40 = vpack.c.bf16 %v1335_v36, %v1333_v34  ;;  %1348 = vpow2.f32 %v1020_v38 }
  0x5a   :  { %1168 = vmatprep.subr.bf16.mxu0 %v1288_v45  ;;  %1350 = vpow2.f32 %v1021_v41  ;;  %v1434_v45 = vmov 0.0  }
  0x5b   :  { %1189 = vmatpush3.bf16.msra.mxu1 %v1287_v44  ;;  %1114 = vmatprep.mubr.msk.bf16.mxu1 %vm1491_vm1, %v1113_v40  ;;  %v1339_v44 = vpop.eup %1338 }
  0x5c   :  { %1190 = vmatprep.subr.bf16.mxu1 %v1290_v48  ;;  %v1107_v47 = vpack.c.bf16 %v1339_v44, %v1337_v43 }
  0x5d   :  { %1169 = vmatpush3.bf16.msra.mxu0 %v1289_v46  ;;  %v1341_v46 = vpop.eup %1340 }
  0x5e   :  { %1170 = vmatprep.subr.bf16.mxu0 %v1292_v51  ;;  %1108 = vmatprep.mubr.msk.bf16.mxu0 %vm1491_vm1, %v1107_v47 }
  0x5f   :  { %1191 = vmatpush3.bf16.msra.mxu1 %v1291_v50  ;;  %v1343_v48 = vpop.eup %1342 }
  0x60   :  { %1192 = vmatprep.subr.bf16.mxu1 %v1294_v60  ;;  %v1110_v50 = vpack.c.bf16 %v1343_v48, %v1341_v46  ;;  %v1311_v60 = vld [vmem:[#allocation6 + $0x218] sm:$0xff]  }
  0x61   :  { %1171 = vmatpush3.bf16.msra.mxu0 %v1293_v59  ;;  %v1345_v51 = vpop.eup %1344 }
  0x62   :  { %1172 = vmatprep.subr.bf16.mxu0 %v1296_v3  ;;  %v1347_v52 = vpop.eup %1346  ;;  %v1315_v3 = vld [vmem:[#allocation6 + $0x238] sm:$0xff]  }
  0x63   :  { %1193 = vmatpush3.bf16.msra.mxu1 %v1295_v63  ;;  %v1116_v53 = vpack.c.bf16 %v1347_v52, %v1345_v51  ;;  %v1349_v55 = vpop.eup %1348 }
  0x64   :  { %1194 = vmatprep.subr.bf16.mxu1 %v1298_v11  ;;  %v1351_v56 = vpop.eup %1350  ;;  %v184_v58 = vadd.f32 1.0, %v1349_v55 }
  0x65   :  { %1173 = vmatpush3.bf16.msra.mxu0 %v1297_v7  ;;  %v185_v59 = vadd.f32 1.0, %v1351_v56 }
  0x66   :  { %1174 = vmatprep.subr.bf16.mxu0 %v1300_v17  ;;  %1352 = vrcp.f32 %v184_v58 }
  0x67   :  { %1195 = vmatpush3.bf16.msra.mxu1 %v1299_v15  ;;  %1354 = vrcp.f32 %v185_v59 }
  0x68   :  { %1196 = vmatprep.subr.bf16.mxu1 %v1302_v21 }
  0x69   :  { %1175 = vmatpush3.bf16.msra.mxu0 %v1301_v25 }
  0x6a   :  { %1176 = vmatprep.subr.bf16.mxu0 %v1304_v29 }
  0x6b   :  { %1197 = vmatpush3.bf16.msra.mxu1 %v1303_v35 }
  0x6c   :  { %1198 = vmatprep.subr.bf16.mxu1 %v1306_v37 }
  0x6d   :  { %1177 = vmatpush3.bf16.msra.mxu0 %v1305_v39 }
  0x6e   :  { %1215 = vmatprep.subr.bf16.mxu0 %v1434_v45 }
  0x6f   :  { %1199 = vmatpush3.bf16.msra.mxu1 %v1307_v42 }
  0x70   :  { %1111 = vmatmul.mubr.msk.bf16.vlgmr.msra.gmra.mrb[4].mxu0 %vm1491_vm1, %v1110_v50  ;;  %v1353_v63 = vpop.eup %1352 }
  0x71   :  { %1216 = vmatpush3.bf16.msra.mxu0 %v1308_v49  ;;  %1231 = vmatprep.mubr.msk.bf16.mxu0 %vm1435_vm2, %v1434_v45  ;;  %v1355_v16 = vpop.eup %1354  ;;  %v190_v1 = vmul.f32 %v1353_v63, %v1479_v32 }
  0x72   :  { %1217 = vmatprep.subr.bf16.mxu0 %v1434_v45  ;;  %1117 = vmatmul.mubr.msk.bf16.vlgmr.msra.gmra.mrb[4].mxu1 %vm1491_vm1, %v1116_v53  ;;  %v191_v2 = vmul.f32 %v1355_v16, %v1481_v33 }
  0x74   :  { %v192_v4 = vpack.c.bf16 %v191_v2, %v190_v1 }
  0x75   :  { %1218 = vmatpush3.bf16.msra.mxu0 %v1309_v54 }
  0x76   :  { %1219 = vmatprep.subr.bf16.mxu0 %v1434_v45 }
  0x79   :  { %1220 = vmatpush3.bf16.msra.mxu0 %v1310_v57 }
  0x7a   :  { %1221 = vmatprep.subr.bf16.mxu0 %v1434_v45 }
  0x7d   :  { %1222 = vmatpush3.bf16.msra.mxu0 %v1311_v60 }
  0x7e   :  { %1223 = vmatprep.subr.bf16.mxu0 %v1434_v45 }
  0x81   :  { %1224 = vmatpush3.bf16.msra.mxu0 %v1312_v61 }
  0x82   :  { %1225 = vmatprep.subr.bf16.mxu0 %v1434_v45 }
  0x85   :  { %1226 = vmatpush3.bf16.msra.mxu0 %v1313_v62 }
  0x86   :  { %1227 = vmatprep.subr.bf16.mxu0 %v1434_v45 }
  0x89   :  { %1228 = vmatpush3.bf16.msra.mxu0 %v1314_v0 }
  0x8a   :  { %1229 = vmatprep.subr.bf16.mxu0 %v1434_v45 }
  0x8d   :  { %1230 = vmatpush3.bf16.msra.mxu0 %v1315_v3 }
  0x90   :  { %1232 = vmatmul.mubr.bf16.vlgmr.msra.gmra.mrb[8].mxu0 %v192_v4 }
 0x123   :  { %v1134_v5 = vpop.f32.mrb[0].mxu0 }
 0x124   :  { %v1135_v6 = vpop.f32.mrb[1].mxu0 }
 0x125   :  { %v1156_v7 = vpop.f32.mrb[0].mxu1  ;;  %v1136_v8 = vadd.f32 %v1135_v6, %v1134_v5  ;;  %v1137_v9 = vpop.f32.mrb[2].mxu0 }
 0x126   :  { %v1157_v10 = vpop.f32.mrb[1].mxu1  ;;  %v1138_v11 = vpop.f32.mrb[3].mxu0 }
 0x127   :  { %v1158_v12 = vadd.f32 %v1157_v10, %v1156_v7  ;;  %v1159_v13 = vpop.f32.mrb[2].mxu1  ;;  %v1139_v14 = vadd.f32 %v1138_v11, %v1137_v9 }
 0x128   :  { %v1160_v15 = vpop.f32.mrb[3].mxu1 }
 0x129   :  { %v855_v32 = vadd.f32 %v1158_v12, %v1136_v8  ;;  %v1161_v17 = vadd.f32 %v1160_v15, %v1159_v13 }
 0x12b   :  { %v858_v33 = vadd.f32 %v1161_v17, %v1139_v14 }
 0x143   :  { %v1178_v18 = vpop.f32.mrb[4].mxu0 }
 0x144   :  { %v1179_v19 = vpop.f32.mrb[5].mxu0 }
 0x145   :  { %v1180_v20 = vadd.f32 %v1179_v19, %v1178_v18  ;;  %v1181_v21 = vpop.f32.mrb[6].mxu0  ;;  %v1200_v22 = vpop.f32.mrb[4].mxu1 }
 0x146   :  { %v1182_v23 = vpop.f32.mrb[7].mxu0  ;;  %v1201_v26 = vpop.f32.mrb[5].mxu1 }
 0x147   :  { %v896_v24 = vadd.f32 %v1180_v20, %v855_v32  ;;  %v1183_v25 = vadd.f32 %v1182_v23, %v1181_v21  ;;  %v1202_v27 = vadd.f32 %v1201_v26, %v1200_v22  ;;  %v1203_v28 = vpop.f32.mrb[6].mxu1 }
 0x148   :  { %v1204_v30 = vpop.f32.mrb[7].mxu1 }
 0x149   :  { %v899_v29 = vadd.f32 %v1183_v25, %v858_v33  ;;  %v1205_v31 = vadd.f32 %v1204_v30, %v1203_v28  ;;  %v937_v34 = vadd.f32 %v1202_v27, %v896_v24 }
 0x14b   :  { %v940_v35 = vadd.f32 %v1205_v31, %v899_v29 }
 0x163   :  { %v977_v36 = vpop.f32.mrb[8].mxu0 }
 0x164   :  { %v978_v37 = vadd.f32 %v977_v36, %v937_v34  ;;  %v1233_v38 = vpop.f32.mrb[9].mxu0 }
 0x165   :  { %v980_v39 = vpop.f32.mrb[10].mxu0 }
 0x166   :  { %984 = vst [vmem:[#allocation8] sm:$0xff] %v978_v37  ;;  %v981_v40 = vadd.f32 %v980_v39, %v940_v35  ;;  %v1234_v41 = vpop.f32.mrb[11].mxu0 }
 0x168   :  { %985 = vst [vmem:[#allocation8 + $0x8] sm:$0xff] %v981_v40 }
 0x169   :  { %1411 = shalt.err (!%p1408_p6)
}
 0x16a   :  { %s1412_s12 = scalar_lea.hbm %s1540_s2, 256 }
 0x16b   :  { %p1413_p7 = scmp.ne.s32.totalorder %s1540_s2, %s1412_s12  ;;  %p1416_p8 = scmp.lt.u32.totalorder %s1412_s12, %s1540_s2 }
 0x16d   :  { %p1418_p9 = pnand %p1416_p8, %p1413_p7 }
 0x16f   :  { %1421 = shalt.err (!%p1418_p9)
}
 0x170   :  { %997 = dma.vmem_to_hbm [thread:$0]  %s992_s8, 256, %s1540_s2, [#allocation5], %s1429_s19, %s1429_s19, %s1430_s20  }
 0x171   :  { %1426 = dma.done.wait [#allocation5], 256  }
 0x172   :  { %1427 = vsyncadd [#allocation5], 4294967040 }
 0x173   :  { %1001 = vsyncpa [#allocation4], 1 }
 0x174   :  { %1002 = vsyncpa [#allocation7], 1 }
 0x175   :  { %1003 = vsyncpa [#allocation5], 1 }

</bundles_post_ra>
